<compile_context>
chip_gen: v5e
topology: v5e:2x2
jax: 0.10.0
libtpu: 0.0.40
codegen_flags: <defaults>
</compile_context>

<pallas_src>
import math

import numpy as np
import jax
import jax.numpy as jnp
from jax.experimental import pallas as pl
from jax.experimental.pallas import tpu as pltpu

EMBED_DIM = 32     # embedding_dim used by the DDPM time embedding (even)
MAX_LENGTH = 128   # max_length (bounds the valid range of `time`)
_LANES = 128       # TPU vreg lane width
_SUBLANES = 8      # TPU vreg sublane count (f32)


def _sinusoidal_pe_kernel(t_ref, inv_ref, phase_ref, out_ref):
    """t_ref:   (rows_p, 128) f32 — time pre-repeated to the flat (B*D) layout.
    inv_ref / phase_ref: (1, 128) f32 per-lane constants (inv_freq, cos-phase).
    out_ref:  (rows_p, 128) f32 — row-major flattening of (B, D), lane-dense."""
    out_ref[...] = jnp.sin(t_ref[...] * inv_ref[...] + phase_ref[...])


def sinusoidal_positional_embedding(time, embedding_dim=EMBED_DIM):
    """Equivalent of SinusoidalPositionalEmbedding.forward(time) -> (B, D) f32."""
    B = int(time.shape[0])
    D = int(embedding_dim)
    assert D % 2 == 0, "embedding_dim must be even (as in the PyTorch module)"
    assert _LANES % D == 0, "kernel assumes embedding_dim divides 128"
    # TODO(synk): no bounds check that time < max_length (PyTorch would raise an
    # out-of-range index error); out-of-range times here still give finite values.

    total = B * D
    rows = pl.cdiv(total, _LANES)
    rows_p = max(_SUBLANES, ((rows + _SUBLANES - 1) // _SUBLANES) * _SUBLANES)

    # Per-lane constants at trace time (numpy): the flat index modulo D depends
    # only on the lane because D divides the 128-lane width.
    lane = np.arange(_LANES)
    d = lane % D
    pair = (d - (d % 2)).astype(np.float32)                       # 2 * (d // 2)
    inv_freq = np.exp(pair * (-math.log(10000.0) / D)).astype(np.float32)[None, :]
    phase = ((d % 2) * (math.pi / 2.0)).astype(np.float32)[None, :]  # cos = sin(x+pi/2)

    # Pre-expand `time` to the flat lane-dense layout.  Pad rows/lanes carry
    # t = 0 and produce garbage-but-finite values that are sliced off below —
    # the [:total] slice must stay.
    t_flat = jnp.repeat(time.astype(jnp.float32), D, total_repeat_length=total)
    t_flat = jnp.pad(t_flat, (0, rows_p * _LANES - total))
    t_flat = t_flat.reshape(rows_p, _LANES)

    flat = pl.pallas_call(
        _sinusoidal_pe_kernel,
        out_shape=jax.ShapeDtypeStruct((rows_p, _LANES), jnp.float32),
        in_specs=[pl.BlockSpec(memory_space=pltpu.MemorySpace.VMEM),
                  pl.BlockSpec(memory_space=pltpu.MemorySpace.VMEM),
                  pl.BlockSpec(memory_space=pltpu.MemorySpace.VMEM)],
        out_specs=pl.BlockSpec(memory_space=pltpu.MemorySpace.VMEM),
    )(t_flat, jnp.asarray(inv_freq), jnp.asarray(phase))

    # Row-major flatten of (B, D) is bit-identical to the (rows_p, 128) slab,
    # so the reshape + pad-slice is free layout plumbing outside the kernel.
    return flat.reshape(rows_p * _LANES)[:total].reshape(B, D)


def _reference_pe_table(embedding_dim, max_length):
    """Pure-JAX transcription of the PyTorch _get_positional_encodings()."""
    pe = jnp.zeros((max_length, embedding_dim), jnp.float32)
    position = jnp.arange(max_length, dtype=jnp.float32)[:, None]
    div_term = jnp.exp(
        jnp.arange(0, embedding_dim, 2, dtype=jnp.float32)
        * (-math.log(10000.0) / embedding_dim)
    )
    pe = pe.at[:, 0::2].set(jnp.sin(position * div_term))
    pe = pe.at[:, 1::2].set(jnp.cos(position * div_term))
    return pe


if __name__ == "__main__":
    key = jax.random.PRNGKey(0)
    batch = 8
    time = jax.random.randint(key, (batch,), 0, MAX_LENGTH, dtype=jnp.int32)

    out = jax.block_until_ready(sinusoidal_positional_embedding(time, EMBED_DIM))

    # Check against the exact PyTorch-style precomputed-table gather.  The
    # cos(x) == sin(x + pi/2) rewrite is mathematically exact but not bit-exact
    # (one extra f32 rounding of the phase add before range reduction), so use
    # a slightly relaxed — still tight for unit-range outputs — tolerance.
    ref = _reference_pe_table(EMBED_DIM, MAX_LENGTH)[time, :]
    assert out.shape == (batch, EMBED_DIM) and out.dtype == jnp.float32
    assert jnp.allclose(out, ref, atol=1e-4), "mismatch vs reference PE table"

    print("KERNEL_OK")
</pallas_src>

<mosaic_0001>
module attributes {stable_mosaic.version = 11 : i64} {
  func.func @_sinusoidal_pe_kernel(%arg0: memref<8x128xf32, #tpu.memory_space<vmem>>, %arg1: memref<1x128xf32, #tpu.memory_space<vmem>>, %arg2: memref<1x128xf32, #tpu.memory_space<vmem>>, %arg3: memref<8x128xf32, #tpu.memory_space<vmem>>) attributes {dimension_semantics = [], scalar_prefetch = 0 : i64, scratch_operands = 0 : i64, tpu.core_type = #tpu.core_type<tc>} {
    %c0 = arith.constant 0 : index
    %c0_0 = arith.constant 0 : index
    %0 = vector.load %arg0[%c0, %c0_0] : memref<8x128xf32, #tpu.memory_space<vmem>>, vector<8x128xf32>
    %c0_1 = arith.constant 0 : index
    %c0_2 = arith.constant 0 : index
    %1 = vector.load %arg1[%c0_1, %c0_2] : memref<1x128xf32, #tpu.memory_space<vmem>>, vector<1x128xf32>
    %2 = vector.broadcast %1 : vector<1x128xf32> to vector<8x128xf32>
    %3 = arith.mulf %0, %2 : vector<8x128xf32>
    %c0_3 = arith.constant 0 : index
    %c0_4 = arith.constant 0 : index
    %4 = vector.load %arg2[%c0_3, %c0_4] : memref<1x128xf32, #tpu.memory_space<vmem>>, vector<1x128xf32>
    %5 = vector.broadcast %4 : vector<1x128xf32> to vector<8x128xf32>
    %6 = arith.addf %3, %5 : vector<8x128xf32>
    %7 = math.sin %6 : vector<8x128xf32>
    %c0_5 = arith.constant 0 : index
    %c0_6 = arith.constant 0 : index
    %8 = vector.load %arg3[%c0_5, %c0_6] : memref<8x128xf32, #tpu.memory_space<vmem>>, vector<8x128xf32>
    tpu.vector_store %arg3[%c0_5, %c0_6], %7 {strides = array<i32>} : memref<8x128xf32, #tpu.memory_space<vmem>>, vector<8x128xf32>,
    return
  }
}

</mosaic_0001>

<bundles_post_ra>
// kernel: tpu_custom_call.1
= control target key start
LH: loop header
LB: loop body
LE: loop exit
PB: predicated region body
PF: predicated region fallthrough
CT: control target
= control target key end

     0   :  { %8 = vsyncpa [#allocation3], 0  ;;  %s409_s0 = inlined_call_operand.hbm [shape: f32[8,128], index: 0, kind: input, shape index: {}]   ;;  %s410_s1 = inlined_call_operand.hbm [shape: f32[1,128], index: 1, kind: input, shape index: {}]   ;;  %s411_s2 = inlined_call_operand.vmem [shape: f32[1,128], index: 2, kind: input, shape index: {}]   ;;  %s412_s3 = inlined_call_operand.hbm [shape: f32[8,128], index: 3, kind: output, shape index: {}]  }
   0x1   :  { %9 = vsyncpa [#allocation6], 0 }
   0x2   :  { %10 = vsyncpa [#allocation4], 0  ;;  %s16_s14 = sshll.u32 %s409_s0, 4  ;;  %s321_s15 = smov [#allocation2]   ;;  %s17_s14 = int_to_ptr.hbm [resolvable:$true] %s16_s14 }
   0x3   :  { %s18_s16 = sshll.u32 %s321_s15, 4  ;;  %s27_s19 = sshll.u32 %s410_s1, 4  ;;  %s19_s16 = int_to_ptr.vmem [resolvable:$true] %s18_s16  ;;  %s28_s19 = int_to_ptr.hbm [resolvable:$true] %s27_s19 }
   0x4   :  { %21 = dma.hbm_to_vmem [thread:$0]  %s17_s14, 128, %s19_s16, [#allocation3]  }
   0x5   :  { %s322_s20 = smov [#allocation5]  }
   0x6   :  { %s29_s21 = sshll.u32 %s322_s20, 4  ;;  %s30_s21 = int_to_ptr.vmem [resolvable:$true] %s29_s21 }
   0x7   :  { %32 = dma.hbm_to_vmem [thread:$0]  %s28_s19, 16, %s30_s21, [#allocation6]  }
   0x8   :  { %315 = dma.done.wait [#allocation3], 128  }
   0x9   :  { %316 = vsyncadd [#allocation3], 4294967168 }
   0xa   :  { %317 = dma.done.wait [#allocation6], 16  }
   0xb   :  { %318 = vsyncadd [#allocation6], 4294967280  ;;  %v43_v0 = vld [vmem:[#allocation2] sm:$0xff]  ;;  %v241_v1 = vld [vmem:[#allocation5] ss:$0 sm:$0xff]  ;;  %s330_s1 = smov [#allocation7]  }
   0xc   :  { %v242_v2 = vld [vmem:[%s411_s2] ss:$0 sm:$0xff]  ;;  %v48_v3 = vmul.f32 %v241_v1, %v43_v0  ;;  %v323_v16 = vmov 683565275   ;;  %v324_v18 = vmov 2475754826  }
   0xd   :  { %v325_v20 = vmov 2131351028   ;;  %v326_v22 = vmov 2102212464   ;;  %v327_v24 = vmov 920167782  }
   0xe   :  { %v360_v4 = vadd.f32 %v242_v2, %v48_v3  ;;  %v328_v30 = vmov 1326507024   ;;  %s215_s2 = sshll.u32 %s330_s1, 4  ;;  %s217_s25 = sshll.u32 %s412_s3, 4  ;;  %s216_s2 = int_to_ptr.vmem [resolvable:$true] %s215_s2  ;;  %s218_s25 = int_to_ptr.hbm [resolvable:$true] %s217_s25 }
  0x10   :  { %v57_v5 = vand.u32 2139095040, %v360_v4  ;;  %v54_v7 = vand.u32 2147483647, %v360_v4  ;;  %vm56_vm12 = vcmp.lt.s32.totalorder %v360_v4, 0 }
  0x12   :  { %v58_v6 = vshrl.u32 %v57_v5, 23  ;;  %v61_v10 = vand.u32 8388607, %v54_v7  ;;  %v329_v5 = vmov 0   ;;  %vm55_vm13 = vcmp.le.f32.partialorder %v54_v7, 0.7853982 }
  0x14   :  { %v228_v8 = vadd.s32 4294967169, %v58_v6  ;;  %v62_v13 = vor.u32 8388608, %v61_v10 }
  0x16   :  { %v64_v9 = vadd.s32 1, %v228_v8  ;;  %v369_v32 = vshll.u32 %v62_v13, 8 }
  0x18   :  { %vm65_vm0 = vcmp.gt.s32.totalorder %v64_v9, 0  ;;  %v103_v44 = vand.u32 65535, %v369_v32  ;;  %v104_v45 = vshrl.u32 %v369_v32, 16 }
  0x19   :  { %v66_v11 = vsel %vm65_vm0, %v64_v9, 0 }
  0x1a   :  { %v68_v12 = vand.u32 31, %v66_v11  ;;  %v366_v14 = vshrl.u32 %v66_v11, 5 }
  0x1c   :  { %v69_v15 = vsub.s32 32, %v68_v12  ;;  %v71_v17 = vshll.u32 %v323_v16, %v68_v12  ;;  %v74_v19 = vshll.u32 %v324_v18, %v68_v12  ;;  %v77_v21 = vshll.u32 %v325_v20, %v68_v12 }
  0x1d   :  { %v80_v23 = vshll.u32 %v326_v22, %v68_v12  ;;  %v83_v25 = vshll.u32 %v327_v24, %v68_v12  ;;  %vm86_vm1 = vcmp.lt.s32.totalorder %v366_v14, 1  ;;  %vm89_vm2 = vcmp.lt.s32.totalorder %v366_v14, 4 }
  0x1e   :  { %v72_v26 = vshrl.u32 %v324_v18, %v69_v15  ;;  %v75_v27 = vshrl.u32 %v325_v20, %v69_v15  ;;  %v78_v28 = vshrl.u32 %v326_v22, %v69_v15  ;;  %v81_v29 = vshrl.u32 %v327_v24, %v69_v15 }
  0x1f   :  { %v84_v31 = vshrl.u32 %v328_v30, %v69_v15  ;;  %vm88_vm3 = vcmp.lt.s32.totalorder %v366_v14, 3  ;;  %vm87_vm4 = vcmp.lt.s32.totalorder %v366_v14, 2  ;;  %v70_v52 = vshrl.u32 %v323_v16, %v69_v15 }
  0x20   :  { %v73_v33 = vor.u32 %v72_v26, %v71_v17  ;;  %v76_v34 = vor.u32 %v75_v27, %v74_v19  ;;  %v79_v35 = vor.u32 %v78_v28, %v77_v21  ;;  %v82_v36 = vor.u32 %v81_v29, %v80_v23 }
  0x21   :  { %v85_v37 = vor.u32 %v84_v31, %v83_v25 }
  0x22   :  { %v94_v38 = vsel %vm86_vm1, %v73_v33, %v76_v34  ;;  %v98_v39 = vsel %vm86_vm1, %v76_v34, %v79_v35  ;;  %v95_v40 = vsel %vm89_vm2, %v82_v36, 920167782  ;;  %v90_v1 = vsel %vm86_vm1, %v70_v52, %v73_v33 }
  0x23   :  { %v99_v41 = vsel %vm89_vm2, %v85_v37, 1326507024  ;;  %v96_v42 = vsel %vm88_vm3, %v79_v35, %v95_v40  ;;  %v91_v3 = vsel %vm89_vm2, %v79_v35, 2102212464  ;;  %vm197_vm1 = vweird.f32 %v360_v4 }
  0x24   :  { %v100_v43 = vsel %vm88_vm3, %v82_v36, %v99_v41  ;;  %v97_v46 = vsel %vm87_vm4, %v94_v38, %v96_v42  ;;  %v92_v16 = vsel %vm88_vm3, %v76_v34, %v91_v3 }
  0x25   :  { %v101_v47 = vsel %vm87_vm4, %v98_v39, %v100_v43  ;;  %v127_v50 = vand.u32 65535, %v97_v46  ;;  %v128_v51 = vshrl.u32 %v97_v46, 16  ;;  %v93_v24 = vsel %vm87_vm4, %v90_v1, %v92_v16 }
  0x26   :  { %v105_v48 = vand.u32 65535, %v101_v47  ;;  %v106_v49 = vshrl.u32 %v101_v47, 16  ;;  %v147_v28 = vmul.u32 %v369_v32, %v93_v24 }
  0x27   :  { %v129_v56 = vmul.u32 %v127_v50, %v103_v44  ;;  %v130_v57 = vmul.u32 %v128_v51, %v103_v44  ;;  %v131_v58 = vmul.u32 %v127_v50, %v104_v45  ;;  %v132_v62 = vmul.u32 %v128_v51, %v104_v45 }
  0x28   :  { %v107_v53 = vmul.u32 %v105_v48, %v103_v44  ;;  %v108_v54 = vmul.u32 %v106_v49, %v103_v44  ;;  %v109_v55 = vmul.u32 %v105_v48, %v104_v45  ;;  %v110_v59 = vmul.u32 %v106_v49, %v104_v45 }
  0x29   :  { %v133_v63 = vshll.u32 %v130_v57, 16  ;;  %v135_v0 = vshll.u32 %v131_v58, 16  ;;  %v134_v13 = vshrl.u32 %v130_v57, 16  ;;  %v136_v20 = vshrl.u32 %v131_v58, 16 }
  0x2a   :  { %v111_v60 = vshll.u32 %v108_v54, 16  ;;  %v113_v61 = vshll.u32 %v109_v55, 16  ;;  %v112_v9 = vshrl.u32 %v108_v54, 16  ;;  %v114_v17 = vshrl.u32 %v109_v55, 16 }
  0x2b   :  { %vm137_vm6 = vc.u32 %v129_v56, %v133_v63  ;;  %v139_v8 = vadd.s32 %v133_v63, %v129_v56 }
  0x2c   :  { %vm115_vm5 = vc.u32 %v107_v53, %v111_v60  ;;  %v117_v2 = vadd.s32 %v111_v60, %v107_v53  ;;  %v138_v11 = vsel %vm137_vm6, 1, %v329_v5 }
  0x2d   :  { %v116_v6 = vsel %vm115_vm5, 1, %v329_v5  ;;  %v140_v15 = vadd.s32 %v138_v11, %v132_v62  ;;  %vm141_vm8 = vc.u32 %v139_v8, %v135_v0  ;;  %v143_v23 = vadd.s32 %v139_v8, %v135_v0 }
  0x2e   :  { %v118_v10 = vadd.s32 %v116_v6, %v110_v59  ;;  %vm119_vm7 = vc.u32 %v117_v2, %v113_v61  ;;  %v142_v19 = vsel %vm141_vm8, 1, %v329_v5 }
  0x2f   :  { %v120_v12 = vsel %vm119_vm7, 1, %v329_v5  ;;  %v144_v21 = vadd.s32 %v142_v19, %v140_v15 }
  0x30   :  { %v122_v18 = vadd.s32 %v120_v12, %v118_v10 }
  0x31   :  { %v145_v25 = vadd.s32 %v144_v21, %v134_v13 }
  0x32   :  { %v123_v22 = vadd.s32 %v122_v18, %v112_v9 }
  0x33   :  { %v146_v27 = vadd.s32 %v145_v25, %v136_v20 }
  0x34   :  { %v124_v26 = vadd.s32 %v123_v22, %v114_v17 }
  0x35   :  { %v150_v29 = vadd.s32 1, %v146_v27 }
  0x36   :  { %vm149_vm9 = vc.u32 %v124_v26, %v143_v23  ;;  %v148_v14 = vadd.s32 %v143_v23, %v124_v26 }
  0x37   :  { %v151_v30 = vsel %vm149_vm9, %v150_v29, %v146_v27 }
  0x38   :  { %v152_v31 = vadd.s32 %v151_v30, %v147_v28 }
  0x3a   :  { %v153_v33 = vadd.s32 536870912, %v152_v31 }
  0x3c   :  { %v154_v34 = vshrl.u32 %v153_v33, 30 }
  0x3e   :  { %v155_v35 = vshll.u32 %v154_v34, 30  ;;  %v178_v52 = vsub.s32 4, %v154_v34 }
  0x40   :  { %v156_v36 = vsub.s32 %v152_v31, %v155_v35  ;;  %v179_v55 = vsel %vm56_vm12, %v178_v52, %v154_v34 }
  0x41   :  { %v181_v58 = vsel %vm55_vm13, 0, %v179_v55 }
  0x42   :  { %vm157_vm10 = vcmp.lt.s32.totalorder %v156_v36, 0  ;;  %v158_v37 = vsub.s32 0, %v156_v36  ;;  %v198_v63 = vadd.s32 3, %v181_v58 }
  0x44   :  { %v159_v38 = vsel %vm157_vm10, %v158_v37, %v156_v36  ;;  %v199_v5 = vand.u32 3, %v198_v63 }
  0x45   :  { %v160_v39 = vclz %v159_v38 }
  0x46   :  { %vm204_vm14 = vcmp.eq.s32.totalorder %v199_v5, 2  ;;  %vm201_vm15 = vcmp.eq.s32.totalorder %v199_v5, 0  ;;  %vm200_vm0 = vcmp.lt.s32.totalorder %v199_v5, 2 }
  0x47   :  { %v229_v40 = vadd.s32 4294967294, %v160_v39 }
  0x49   :  { %vm230_vm11 = vcmp.lt.s32.totalorder %v229_v40, 0 }
  0x4a   :  { %v163_v41 = vsel %vm230_vm11, 0, %v229_v40 }
  0x4b   :  { %v164_v42 = vsub.s32 32, %v163_v41  ;;  %v165_v43 = vshll.u32 %v156_v36, %v163_v41  ;;  %v168_v44 = vsub.s32 4294967266, %v163_v41 }
  0x4d   :  { %v166_v32 = vshrl.u32 %v148_v14, %v164_v42  ;;  %v169_v45 = vadd.s32 127, %v168_v44 }
  0x4f   :  { %v167_v46 = vor.u32 %v166_v32, %v165_v43  ;;  %v170_v47 = vshll.u32 %v169_v45, 23 }
  0x51   :  { %v171_v48 = vor.u32 4788187, %v170_v47  ;;  %v174_v49 = vcvt.s32.f32 %v167_v46 }
  0x53   :  { %v172_v50 = vand.u32 2147483647, %v171_v48 }
  0x55   :  { %v175_v51 = vmul.f32 %v174_v49, %v172_v50 }
  0x57   :  { %v176_v53 = vxor.u32 2147483648, %v175_v51 }
  0x59   :  { %v177_v54 = vsel %vm56_vm12, %v176_v53, %v175_v51 }
  0x5a   :  { %v180_v56 = vsel %vm55_vm13, %v360_v4, %v177_v54 }
  0x5b   :  { %v182_v57 = vmul.f32 %v180_v56, %v180_v56 }
  0x5d   :  { %v183_v59 = vmul.f32 -0.001358992, %v182_v57  ;;  %v190_v60 = vmul.f32 -0.00019511016, %v182_v57 }
  0x5f   :  { %v184_v61 = vadd.f32 0.041655596, %v183_v59  ;;  %v191_v62 = vadd.f32 0.008332121, %v190_v60 }
  0x61   :  { %v185_v0 = vmul.f32 %v184_v61, %v182_v57  ;;  %v192_v1 = vmul.f32 %v191_v62, %v182_v57 }
  0x63   :  { %v186_v2 = vadd.f32 -0.4999988, %v185_v0  ;;  %v193_v3 = vadd.f32 -0.16666654, %v192_v1 }
  0x65   :  { %v187_v6 = vmul.f32 %v186_v2, %v182_v57  ;;  %v194_v8 = vmul.f32 %v193_v3, %v182_v57 }
  0x67   :  { %v188_v7 = vadd.f32 1.0, %v187_v6  ;;  %v195_v9 = vadd.f32 1.0, %v194_v8 }
  0x69   :  { %v196_v10 = vmul.f32 %v195_v9, %v180_v56  ;;  %v205_v11 = vxor.u32 2147483648, %v188_v7 }
  0x6b   :  { %v202_v12 = vxor.u32 2147483648, %v196_v10  ;;  %v206_v13 = vsel %vm204_vm14, %v205_v11, %v196_v10 }
  0x6d   :  { %v203_v15 = vsel %vm201_vm15, %v188_v7, %v202_v12 }
  0x6e   :  { %v207_v16 = vsel %vm200_vm0, %v203_v15, %v206_v13 }
  0x6f   :  { %v208_v17 = vsel %vm197_vm1, nan, %v207_v16 }
  0x70   :  { %209 = vst [vmem:[#allocation7] sm:$0xff] %v208_v17 }
  0x71   :  { %220 = dma.vmem_to_hbm [thread:$0]  %s216_s2, 128, %s218_s25, [#allocation4]  }
  0x72   :  { %319 = dma.done.wait [#allocation4], 128  }
  0x73   :  { %320 = vsyncadd [#allocation4], 4294967168 }
  0x74   :  { %225 = vsyncpa [#allocation3], 1 }
  0x75   :  { %226 = vsyncpa [#allocation6], 1 }
  0x76   :  { %227 = vsyncpa [#allocation4], 1 }

</bundles_post_ra>
